<compile_context>
chip_gen: v6e
topology: v6e:2x2x1
jax: 0.10.0
libtpu: 0.0.40
codegen_flags: <defaults>
</compile_context>

<pallas_src>
import functools

import jax
import jax.numpy as jnp
from jax.experimental import pallas as pl
from jax.experimental.pallas import tpu as pltpu


def qnet_kernel(s_ref, w1_ref, b1_ref, w2_ref, b2_ref, w3_ref, b3_ref, q_ref,
                *, precision=None):
    # layer1 + ReLU (MXU matmul, f32 accumulation; bias/ReLU in f32 on VPU)
    x = s_ref[...].astype(w1_ref.dtype)          # cast inside kernel (no wrapper pass)
    h1 = jnp.dot(x, w1_ref[...], precision=precision,
                 preferred_element_type=jnp.float32)
    h1 = jnp.maximum(h1 + b1_ref[...], 0.0)
    # layer2 + ReLU
    h2 = jnp.dot(h1.astype(w2_ref.dtype), w2_ref[...], precision=precision,
                 preferred_element_type=jnp.float32)
    h2 = jnp.maximum(h2 + b2_ref[...], 0.0)
    # output (no activation); out feature dim padded to 128 -> full-lane vst
    q = jnp.dot(h2.astype(w3_ref.dtype), w3_ref[...], precision=precision,
                preferred_element_type=jnp.float32)
    q_ref[...] = (q + b3_ref[...]).astype(q_ref.dtype)


def prepare_params(params, compute_dtype=jnp.bfloat16):
    """One-time param prep: lane-pad w3/b3 to a multiple of 128 and cast the
    weight matrices to the MXU compute dtype. Biases stay f32 (bias add + ReLU
    run in f32). Returns a dict also carrying the original (static) a_dim."""
    a_dim = params["w3"].shape[1]
    a_pad = max(128, pl.cdiv(a_dim, 128) * 128)
    w3, b3 = params["w3"], params["b3"]
    if a_pad != a_dim:
        w3 = jnp.pad(w3, ((0, 0), (0, a_pad - a_dim)))
        b3 = jnp.pad(b3, ((0, 0), (0, a_pad - a_dim)))
    return dict(
        w1=params["w1"].astype(compute_dtype),
        b1=params["b1"].astype(jnp.float32),
        w2=params["w2"].astype(compute_dtype),
        b2=params["b2"].astype(jnp.float32),
        w3=w3.astype(compute_dtype),
        b3=b3.astype(jnp.float32),
        a_dim=a_dim,
    )


def qnetwork_forward(s, params, *, block_b=4096, compute_dtype=jnp.bfloat16,
                     out_dtype=None, precision=None, return_padded=False):
    """Fused QNetwork forward.

    s: (B, s_dim) float32.
    params: either raw {w1,b1,w2,b2,w3,b3} (prepared on the fly with
        `compute_dtype`) or the output of `prepare_params` (preferred: hoists
        padding/casting out of the per-call path).
    out_dtype: output storage dtype (default: s.dtype). bf16 halves the
        dominant padded-output HBM writeback.
    precision: pass jax.lax.Precision.HIGHEST with f32 params for strict f32
        parity (at ~3x MXU cost). bf16 weights with f32 accumulation is the
        intended fast path on v5e/v6e/v7x; Q-values then carry ~bf16-level
        quantization error.
    return_padded: if True, return the (Bp, a_pad) padded result directly
        (no extra HBM pass for slicing); caller indexes [:B, :a_dim] lazily.
    """
    if "a_dim" not in params:
        params = prepare_params(params, compute_dtype)
    a_dim = params["a_dim"]
    w1, b1 = params["w1"], params["b1"]
    w2, b2 = params["w2"], params["b2"]
    w3, b3 = params["w3"], params["b3"]

    B, s_dim = s.shape
    nh1 = w1.shape[1]
    nh2 = w2.shape[1]
    a_pad = w3.shape[1]

    out_dtype = s.dtype if out_dtype is None else out_dtype
    in_itemsize = jnp.dtype(s.dtype).itemsize
    out_itemsize = jnp.dtype(out_dtype).itemsize

    # --- batch tile selection -------------------------------------------------
    # Cap so double-buffered input+output blocks stay well inside every
    # generation's default scoped VMEM (v5e 16 MiB, v6e/v7x 32 MiB, v7x 64 MiB
    # physical); weights are tiny and VMEM-resident.
    per_row_bytes = 2 * (s_dim * in_itemsize + a_pad * out_itemsize)
    vmem_budget = 12 * 1024 * 1024
    max_tb = max(8, (vmem_budget // per_row_bytes) // 8 * 8)
    block_b = min(block_b, max_tb)

    if B <= block_b:
        if B >= 16:
            # >= 2 grid steps so v7x's 2 TensorCores can both take a batch tile.
            TB = pl.cdiv(pl.cdiv(B, 2), 8) * 8
            Bp = 2 * TB
        else:
            TB, Bp = B, B                    # tiny batch: single block
    else:
        TB = block_b
        Bp = pl.cdiv(B, TB) * TB
    s_in = s if Bp == B else jnp.pad(s, ((0, Bp - B), (0, 0)))
    grid = (Bp // TB,)

    # --- advisory cost estimate -----------------------------------------------
    flops = 2 * Bp * (s_dim * nh1 + nh1 * nh2 + nh2 * a_pad)
    bytes_accessed = int(
        Bp * s_dim * in_itemsize
        + sum(int(a.size) * a.dtype.itemsize for a in (w1, b1, w2, b2, w3, b3))
        + Bp * a_pad * out_itemsize
    )

    def resident(shape):
        # Same block every grid step -> stays resident in VMEM.
        return pl.BlockSpec(shape, lambda i: (0, 0))

    kernel = functools.partial(qnet_kernel, precision=precision)

    q_pad = pl.pallas_call(
        kernel,
        out_shape=jax.ShapeDtypeStruct((Bp, a_pad), out_dtype),
        grid=grid,
        in_specs=[
            pl.BlockSpec((TB, s_dim), lambda i: (i, 0)),   # batch-tiled input
            resident((s_dim, nh1)), resident((1, nh1)),
            resident((nh1, nh2)), resident((1, nh2)),
            resident((nh2, a_pad)), resident((1, a_pad)),
        ],
        out_specs=pl.BlockSpec((TB, a_pad), lambda i: (i, 0)),
        compiler_params=pltpu.CompilerParams(
            dimension_semantics=("parallel",)),             # v7x: share batch across TCs
        cost_estimate=pl.CostEstimate(
            flops=flops, transcendentals=0, bytes_accessed=bytes_accessed),
    )(s_in, w1, b1, w2, b2, w3, b3)

    if return_padded:
        return q_pad
    return q_pad[:B, :a_dim]


def init_params(key, s_dim, a_dim, nhid1=128, nhid2=128):
    """Deterministic synthetic params (PyTorch-Linear-like uniform init)."""
    ks = jax.random.split(key, 6)

    def lin(kw, kb, fan_in, fan_out):
        bound = 1.0 / jnp.sqrt(fan_in)
        w = jax.random.uniform(kw, (fan_in, fan_out), jnp.float32, -bound, bound)
        b = jax.random.uniform(kb, (1, fan_out), jnp.float32, -bound, bound)
        return w, b

    w1, b1 = lin(ks[0], ks[1], s_dim, nhid1)
    w2, b2 = lin(ks[2], ks[3], nhid1, nhid2)
    w3, b3 = lin(ks[4], ks[5], nhid2, a_dim)
    return dict(w1=w1, b1=b1, w2=w2, b2=b2, w3=w3, b3=b3)


def qnetwork_ref(s, p):
    h = jax.nn.relu(s @ p["w1"] + p["b1"])
    h = jax.nn.relu(h @ p["w2"] + p["b2"])
    return h @ p["w3"] + p["b3"]


if __name__ == "__main__":
    key = jax.random.PRNGKey(0)
    k_s, k_p, k_big, k_mid = jax.random.split(key, 4)

    s_dim, a_dim = 16, 4
    params = init_params(k_p, s_dim, a_dim)

    # One-time param preparation (padding + dtype casts hoisted out of forward).
    params_bf16 = prepare_params(params, compute_dtype=jnp.bfloat16)
    params_f32 = prepare_params(params, compute_dtype=jnp.float32)

    # --- small batch, strict f32 parity path ---------------------------------
    B = 8
    s = jax.random.normal(k_s, (B, s_dim), jnp.float32)
    q = qnetwork_forward(s, params_f32, precision=jax.lax.Precision.HIGHEST)
    jax.block_until_ready(q)
    q_ref = qnetwork_ref(s, params)
    assert q.shape == (B, a_dim)
    assert jnp.allclose(q, q_ref, atol=1e-5, rtol=1e-5)

    # --- larger ragged batch, default bf16 MXU path (tiled grid + padding) ---
    Bb = 1027
    s_big = jax.random.normal(k_big, (Bb, s_dim), jnp.float32)
    q_big = qnetwork_forward(s_big, params_bf16, block_b=512)
    jax.block_until_ready(q_big)
    q_big_ref = qnetwork_ref(s_big, params)
    assert q_big.shape == (Bb, a_dim)
    assert jnp.allclose(q_big, q_big_ref, atol=1e-1, rtol=1e-1)

    # --- mid-size batch: >=2 grid steps (v7x both TCs), bf16 output,
    #     padded return (no post-kernel slice pass) ----------------------------
    Bm = 100
    s_mid = jax.random.normal(k_mid, (Bm, s_dim), jnp.float32)
    q_pad = qnetwork_forward(s_mid, params_bf16, out_dtype=jnp.bfloat16,
                             return_padded=True)
    jax.block_until_ready(q_pad)
    assert q_pad.shape[0] >= Bm and q_pad.shape[1] % 128 == 0
    q_mid = q_pad[:Bm, :a_dim].astype(jnp.float32)   # lazy consumer-side index
    q_mid_ref = qnetwork_ref(s_mid, params)
    assert jnp.allclose(q_mid, q_mid_ref, atol=2e-1, rtol=2e-1)

    print("KERNEL_OK")
</pallas_src>

<mosaic_0001>
module attributes {stable_mosaic.version = 11 : i64} {
  func.func @qnet_kernel(%arg0: i32, %arg1: memref<8x16xf32, #tpu.memory_space<vmem>>, %arg2: memref<16x128xf32, #tpu.memory_space<vmem>>, %arg3: memref<1x128xf32, #tpu.memory_space<vmem>>, %arg4: memref<128x128xf32, #tpu.memory_space<vmem>>, %arg5: memref<1x128xf32, #tpu.memory_space<vmem>>, %arg6: memref<128x128xf32, #tpu.memory_space<vmem>>, %arg7: memref<1x128xf32, #tpu.memory_space<vmem>>, %arg8: memref<8x128xf32, #tpu.memory_space<vmem>>) attributes {dimension_semantics = [#tpu.dimension_semantics<parallel>], iteration_bounds = array<i64: 1>, scalar_prefetch = 0 : i64, scratch_operands = 0 : i64, tpu.core_type = #tpu.core_type<tc>, window_params = [{transform_indices = @transform_0, window_bounds = array<i64: 8, 16>}, {pipeline_mode = #tpu.pipeline_mode<synchronous>, transform_indices = @transform_1, window_bounds = array<i64: 16, 128>}, {pipeline_mode = #tpu.pipeline_mode<synchronous>, transform_indices = @transform_2, window_bounds = array<i64: 1, 128>}, {pipeline_mode = #tpu.pipeline_mode<synchronous>, transform_indices = @transform_3, window_bounds = array<i64: 128, 128>}, {pipeline_mode = #tpu.pipeline_mode<synchronous>, transform_indices = @transform_4, window_bounds = array<i64: 1, 128>}, {pipeline_mode = #tpu.pipeline_mode<synchronous>, transform_indices = @transform_5, window_bounds = array<i64: 128, 128>}, {pipeline_mode = #tpu.pipeline_mode<synchronous>, transform_indices = @transform_6, window_bounds = array<i64: 1, 128>}, {transform_indices = @transform_7, window_bounds = array<i64: 8, 128>}]} {
    %c0 = arith.constant 0 : index
    %c0_0 = arith.constant 0 : index
    %0 = vector.load %arg1[%c0, %c0_0] : memref<8x16xf32, #tpu.memory_space<vmem>>, vector<8x16xf32>
    %c0_1 = arith.constant 0 : index
    %c0_2 = arith.constant 0 : index
    %1 = vector.load %arg2[%c0_1, %c0_2] : memref<16x128xf32, #tpu.memory_space<vmem>>, vector<16x128xf32>
    %cst = arith.constant dense<0.000000e+00> : vector<8x128xf32>
    %2 = tpu.matmul %0, %1, %cst {dimension_numbers = #tpu.dot_dimension_numbers<[1], [0], [0], [1], [0, 0, 1, 1], [], []>, precision = #tpu.contract_precision<fp32>} : vector<8x16xf32>, vector<16x128xf32>, vector<8x128xf32> -> vector<8x128xf32>
    %c0_3 = arith.constant 0 : index
    %c0_4 = arith.constant 0 : index
    %3 = vector.load %arg3[%c0_3, %c0_4] : memref<1x128xf32, #tpu.memory_space<vmem>>, vector<1x128xf32>
    %4 = vector.broadcast %3 : vector<1x128xf32> to vector<8x128xf32>
    %5 = arith.addf %2, %4 : vector<8x128xf32>
    %cst_5 = arith.constant 0.000000e+00 : f32
    %6 = vector.broadcast %cst_5 : f32 to vector<8x128xf32>
    %7 = arith.maximumf %5, %6 : vector<8x128xf32>
    %c0_6 = arith.constant 0 : index
    %c0_7 = arith.constant 0 : index
    %8 = vector.load %arg4[%c0_6, %c0_7] : memref<128x128xf32, #tpu.memory_space<vmem>>, vector<128x128xf32>
    %cst_8 = arith.constant dense<0.000000e+00> : vector<8x128xf32>
    %9 = tpu.matmul %7, %8, %cst_8 {dimension_numbers = #tpu.dot_dimension_numbers<[1], [0], [0], [1], [0, 0, 1, 1], [], []>, precision = #tpu.contract_precision<fp32>} : vector<8x128xf32>, vector<128x128xf32>, vector<8x128xf32> -> vector<8x128xf32>
    %c0_9 = arith.constant 0 : index
    %c0_10 = arith.constant 0 : index
    %10 = vector.load %arg5[%c0_9, %c0_10] : memref<1x128xf32, #tpu.memory_space<vmem>>, vector<1x128xf32>
    %11 = vector.broadcast %10 : vector<1x128xf32> to vector<8x128xf32>
    %12 = arith.addf %9, %11 : vector<8x128xf32>
    %cst_11 = arith.constant 0.000000e+00 : f32
    %13 = vector.broadcast %cst_11 : f32 to vector<8x128xf32>
    %14 = arith.maximumf %12, %13 : vector<8x128xf32>
    %c0_12 = arith.constant 0 : index
    %c0_13 = arith.constant 0 : index
    %15 = vector.load %arg6[%c0_12, %c0_13] : memref<128x128xf32, #tpu.memory_space<vmem>>, vector<128x128xf32>
    %cst_14 = arith.constant dense<0.000000e+00> : vector<8x128xf32>
    %16 = tpu.matmul %14, %15, %cst_14 {dimension_numbers = #tpu.dot_dimension_numbers<[1], [0], [0], [1], [0, 0, 1, 1], [], []>, precision = #tpu.contract_precision<fp32>} : vector<8x128xf32>, vector<128x128xf32>, vector<8x128xf32> -> vector<8x128xf32>
    %c0_15 = arith.constant 0 : index
    %c0_16 = arith.constant 0 : index
    %17 = vector.load %arg7[%c0_15, %c0_16] : memref<1x128xf32, #tpu.memory_space<vmem>>, vector<1x128xf32>
    %18 = vector.broadcast %17 : vector<1x128xf32> to vector<8x128xf32>
    %19 = arith.addf %16, %18 : vector<8x128xf32>
    %c0_17 = arith.constant 0 : index
    %c0_18 = arith.constant 0 : index
    %20 = vector.load %arg8[%c0_17, %c0_18] : memref<8x128xf32, #tpu.memory_space<vmem>>, vector<8x128xf32>
    tpu.vector_store %arg8[%c0_17, %c0_18], %19 {strides = array<i32>} : memref<8x128xf32, #tpu.memory_space<vmem>>, vector<8x128xf32>,
    return
  }
  func.func @transform_0(%arg0: i32) -> (i32, i32) {
    %c0_i32 = arith.constant 0 : i32
    %c0_i32_0 = arith.constant 0 : i32
    return %arg0, %c0_i32 : i32, i32
  }
  func.func @transform_1(%arg0: i32) -> (i32, i32) {
    %c0_i32 = arith.constant 0 : i32
    %c0_i32_0 = arith.constant 0 : i32
    %c0_i32_1 = arith.constant 0 : i32
    return %c0_i32, %c0_i32_0 : i32, i32
  }
  func.func @transform_2(%arg0: i32) -> (i32, i32) {
    %c0_i32 = arith.constant 0 : i32
    %c0_i32_0 = arith.constant 0 : i32
    %c0_i32_1 = arith.constant 0 : i32
    return %c0_i32, %c0_i32_0 : i32, i32
  }
  func.func @transform_3(%arg0: i32) -> (i32, i32) {
    %c0_i32 = arith.constant 0 : i32
    %c0_i32_0 = arith.constant 0 : i32
    %c0_i32_1 = arith.constant 0 : i32
    return %c0_i32, %c0_i32_0 : i32, i32
  }
  func.func @transform_4(%arg0: i32) -> (i32, i32) {
    %c0_i32 = arith.constant 0 : i32
    %c0_i32_0 = arith.constant 0 : i32
    %c0_i32_1 = arith.constant 0 : i32
    return %c0_i32, %c0_i32_0 : i32, i32
  }
  func.func @transform_5(%arg0: i32) -> (i32, i32) {
    %c0_i32 = arith.constant 0 : i32
    %c0_i32_0 = arith.constant 0 : i32
    %c0_i32_1 = arith.constant 0 : i32
    return %c0_i32, %c0_i32_0 : i32, i32
  }
  func.func @transform_6(%arg0: i32) -> (i32, i32) {
    %c0_i32 = arith.constant 0 : i32
    %c0_i32_0 = arith.constant 0 : i32
    %c0_i32_1 = arith.constant 0 : i32
    return %c0_i32, %c0_i32_0 : i32, i32
  }
  func.func @transform_7(%arg0: i32) -> (i32, i32) {
    %c0_i32 = arith.constant 0 : i32
    %c0_i32_0 = arith.constant 0 : i32
    return %arg0, %c0_i32 : i32, i32
  }
}

</mosaic_0001>

<bundles_post_ra>
// kernel: tpu_custom_call.1
= control target key start
LH: loop header
LB: loop body
LE: loop exit
PB: predicated region body
PF: predicated region fallthrough
CT: control target
= control target key end

     0   :  { %12 = vsyncpa [#allocation3], 0  ;;  %s3547_s0 = inlined_call_operand.hbm [shape: f32[8,16], index: 0, kind: input, shape index: {}]   ;;  %s3548_s1 = inlined_call_operand.hbm [shape: f32[16,128], index: 1, kind: input, shape index: {}]   ;;  %s3549_s2 = inlined_call_operand.vmem [shape: f32[1,128], index: 2, kind: input, shape index: {}]   ;;  %s3550_s3 = inlined_call_operand.hbm [shape: f32[128,128], index: 3, kind: input, shape index: {}]   ;;  %s3551_s4 = inlined_call_operand.vmem [shape: f32[1,128], index: 4, kind: input, shape index: {}]   ;;  %s3552_s5 = inlined_call_operand.hbm [shape: f32[128,128], index: 5, kind: input, shape index: {}]   ;;  %s3553_s6 = inlined_call_operand.vmem [shape: f32[1,128], index: 6, kind: input, shape index: {}]   ;;  %s3554_s7 = inlined_call_operand.hbm [shape: f32[8,128], index: 7, kind: output, shape index: {}]  }
   0x1   :  { %13 = vsyncpa [#allocation6], 0 }
   0x2   :  { %14 = vsyncpa [#allocation9], 0 }
   0x3   :  { %15 = vsyncpa [#allocation4], 0  ;;  %s2705_s24 = smov [#allocation5]  }
   0x4   :  { %s31_s25 = sshll.u32 %s2705_s24, 4  ;;  %s32_s25 = int_to_ptr.vmem [resolvable:$true] %s31_s25 }
   0x5   :  { %s2605_s26 = scalar_lea.vmem %s32_s25, 256  ;;  %p2610_p1 = scmp.lt.s32.totalorder %s32_s25, %s32_s25 }
   0x6   :  { %p2606_p0 = scmp.ne.s32.totalorder %s32_s25, %s2605_s26  ;;  %p2611_p2 = scmp.lt.s32.totalorder %s2605_s26, %s2605_s26 }
   0x8   :  { %p2612_p3 = por %p2611_p2, %p2610_p1 }
   0xa   :  { %p2613_p4 = pnand %p2612_p3, %p2606_p0 }
   0xc   :  { %2616 = shalt.err (!%p2613_p4)
}
   0xd   :  { %s2706_s27 = smov 128   ;;  %s2707_s28 = smov 8  }
   0xe   :  { %37 = dma.hbm_to_vmem [thread:$0]  %s3548_s1, 256, %s32_s25, [#allocation6], %s2706_s27, %s2706_s27, %s2707_s28  }
   0xf   :  { %s2708_s8 = smov [#allocation2]   ;;  %s2709_s10 = smov [#allocation7]  }
  0x10   :  { %s22_s9 = sshll.u32 %s2708_s8, 4  ;;  %s45_s11 = sshll.u32 %s2709_s10, 4  ;;  %s23_s9 = int_to_ptr.vmem [resolvable:$true] %s22_s9  ;;  %s46_s11 = int_to_ptr.vmem [resolvable:$true] %s45_s11 }
  0x11   :  { %s2625_s12 = scalar_lea.vmem %s23_s9, 128  ;;  %p2630_p6 = scmp.lt.s32.totalorder %s23_s9, %s23_s9 }
  0x12   :  { %p2626_p5 = scmp.ne.s32.totalorder %s23_s9, %s2625_s12  ;;  %p2631_p7 = scmp.lt.s32.totalorder %s2625_s12, %s2625_s12 }
  0x14   :  { %p2632_p8 = por %p2631_p7, %p2630_p6 }
  0x16   :  { %p2633_p9 = pnand %p2632_p8, %p2626_p5 }
  0x18   :  { %2636 = shalt.err (!%p2633_p9)
}
  0x19   :  { %25 = dma.hbm_to_vmem [thread:$0]  %s3547_s0, 128, %s23_s9, [#allocation3]  }
  0x1a   :  { %s2645_s15 = scalar_lea.vmem %s46_s11, 2048  ;;  %p2650_p11 = scmp.lt.s32.totalorder %s46_s11, %s46_s11 }
  0x1b   :  { %p2646_p10 = scmp.ne.s32.totalorder %s46_s11, %s2645_s15  ;;  %p2651_p12 = scmp.lt.s32.totalorder %s2645_s15, %s2645_s15 }
  0x1d   :  { %p2652_p13 = por %p2651_p12, %p2650_p11 }
  0x1f   :  { %p2653_p0 = pnand %p2652_p13, %p2646_p10 }
  0x21   :  { %2656 = shalt.err (!%p2653_p0)
}
  0x22   :  { %51 = dma.hbm_to_vmem [thread:$0]  %s3550_s3, 2048, %s46_s11, [#allocation6], %s2706_s27, %s2706_s27, %s2707_s28  }
  0x23   :  { %s2710_s17 = smov [#allocation8]  }
  0x24   :  { %s59_s18 = sshll.u32 %s2710_s17, 4  ;;  %s60_s18 = int_to_ptr.vmem [resolvable:$true] %s59_s18 }
  0x25   :  { %s2665_s19 = scalar_lea.vmem %s60_s18, 2048  ;;  %p2670_p2 = scmp.lt.s32.totalorder %s60_s18, %s60_s18 }
  0x26   :  { %p2666_p1 = scmp.ne.s32.totalorder %s60_s18, %s2665_s19  ;;  %p2671_p3 = scmp.lt.s32.totalorder %s2665_s19, %s2665_s19 }
  0x28   :  { %p2672_p4 = por %p2671_p3, %p2670_p2 }
  0x2a   :  { %p2673_p5 = pnand %p2672_p4, %p2666_p1 }
  0x2c   :  { %2676 = shalt.err (!%p2673_p5)
}
  0x2d   :  { %65 = dma.hbm_to_vmem [thread:$0]  %s3552_s5, 2048, %s60_s18, [#allocation9], %s2706_s27, %s2706_s27, %s2707_s28  }
  0x2e   :  { %2697 = dma.done.wait [#allocation3], 128  }
  0x2f   :  { %2698 = vsyncadd [#allocation3], 4294967168 }
  0x30   :  { %2699 = dma.done.wait [#allocation6], 2304  }
  0x31   :  { %2700 = vsyncadd [#allocation6], 4294964992 }
  0x32   :  { %2701 = dma.done.wait [#allocation9], 2048  }
  0x33   :  { %2702 = vsyncadd [#allocation9], 4294965248  ;;  %v2711_v0 = vmov 0.0   ;;  %vm2712_vm0 = vmmov 0   ;;  %vm90_vm1 = vcmask 130048   ;;  %v82_v1 = vld [vmem:[#allocation5 + $0x8] sm:$0xff] }
  0x34   :  { %2126 = vmatprep.subr.mxu0 %v2711_v0  ;;  %2133 = vmatprep.subr.mxu1 %v2711_v0  ;;  %v81_v2 = vld [vmem:[#allocation5] sm:$0xff]  ;;  %v80_v3 = vld [vmem:[#allocation2] sm:$0xff]  ;;  %v2781_v4 = vand.u32 4294901760, %v82_v1  ;;  %v569_v10 = vld [vmem:[#allocation7 + $0x78] sm:$0xff]  ;;  %s2713_s23 = smov [#allocation10]  }
  0x35   :  { %2130 = vmatprep.mubr.msk.f32.mxu0 %vm2712_vm0, %v2711_v0  ;;  %2137 = vmatprep.mubr.msk.f32.mxu1 %vm2712_vm0, %v2711_v0  ;;  %v2783_v5 = vand.u32 4294901760, %v81_v2  ;;  %v92_v6 = vsel %vm90_vm1, %v80_v3, 0  ;;  %v568_v14 = vld [vmem:[#allocation7 + $0x70] sm:$0xff]  ;;  %v2794_v16 = vand.u32 4294901760, %v569_v10  ;;  %v567_v19 = vld [vmem:[#allocation7 + $0x68] sm:$0xff]  ;;  %v566_v24 = vld [vmem:[#allocation7 + $0x60] sm:$0xff] }
  0x36   :  { %v2785_v7 = vand.u32 4294901760, %v92_v6  ;;  %2127 = vmatpush3.msra.mxu0 %v2781_v4  ;;  %v201_v8 = vsub.f32 %v82_v1, %v2781_v4  ;;  %v2796_v21 = vand.u32 4294901760, %v568_v14  ;;  %v2801_v27 = vand.u32 4294901760, %v567_v19  ;;  %v565_v28 = vld [vmem:[#allocation7 + $0x58] sm:$0xff]  ;;  %v564_v31 = vld [vmem:[#allocation7 + $0x50] sm:$0xff]  ;;  %v563_v35 = vld [vmem:[#allocation7 + $0x48] sm:$0xff] }
  0x37   :  { %v208_v9 = vsub.f32 %v81_v2, %v2783_v5  ;;  %2128 = vmatprep.subr.mxu0 %v2711_v0  ;;  %v2799_v26 = vsub.f32 %v569_v10, %v2794_v16  ;;  %v2807_v30 = vand.u32 4294901760, %v566_v24  ;;  %v2815_v34 = vand.u32 4294901760, %v565_v28  ;;  %v562_v39 = vld [vmem:[#allocation7 + $0x40] sm:$0xff]  ;;  %v559_v10 = vld [vmem:[#allocation7 + $0x28] sm:$0xff]  ;;  %s1890_s24 = sshll.u32 %s2713_s23, 4  ;;  %s1891_s24 = int_to_ptr.vmem [resolvable:$true] %s1890_s24 }
  0x38   :  { %v162_v11 = vsub.f32 %v92_v6, %v2785_v7  ;;  %2129 = vmatpush3.msra.mxu0 %v2783_v5  ;;  %v202_v12 = vand.u32 4294901760, %v201_v8  ;;  %v2805_v29 = vsub.f32 %v568_v14, %v2796_v21  ;;  %v2813_v33 = vsub.f32 %v567_v19, %v2801_v27  ;;  %v558_v14 = vld [vmem:[#allocation7 + $0x20] sm:$0xff]  ;;  %s2677_s25 = scalar_lea.vmem %s1891_s24, 128  ;;  %p2682_p7 = scmp.lt.s32.totalorder %s1891_s24, %s1891_s24 }
  0x39   :  { %v209_v13 = vand.u32 4294901760, %v208_v9  ;;  %2140 = vmatprep.subr.mxu0 %v2711_v0  ;;  %v671_v32 = vand.u32 4294901760, %v2799_v26  ;;  %v2823_v37 = vsub.f32 %v566_v24, %v2807_v30  ;;  %v2825_v38 = vand.u32 4294901760, %v564_v31  ;;  %p2678_p6 = scmp.ne.s32.totalorder %s1891_s24, %s2677_s25  ;;  %p2683_p8 = scmp.lt.s32.totalorder %s2677_s25, %s2677_s25 }
  0x3a   :  { %v163_v15 = vand.u32 4294901760, %v162_v11  ;;  %v203_v17 = vsub.f32 %v201_v8, %v202_v12  ;;  %v678_v36 = vand.u32 4294901760, %v2805_v29  ;;  %v685_v41 = vand.u32 4294901760, %v2813_v33 }
  0x3b   :  { %v210_v18 = vsub.f32 %v208_v9, %v209_v13  ;;  %v672_v40 = vsub.f32 %v2799_v26, %v671_v32  ;;  %v2835_v42 = vsub.f32 %v565_v28, %v2815_v34  ;;  %v2837_v43 = vand.u32 4294901760, %v563_v35  ;;  %p2684_p9 = por %p2683_p8, %p2682_p7 }
  0x3c   :  { %v164_v20 = vsub.f32 %v162_v11, %v163_v15  ;;  %v204_v22 = vand.u32 4294901760, %v203_v17  ;;  %v679_v44 = vsub.f32 %v2805_v29, %v678_v36  ;;  %v692_v45 = vand.u32 4294901760, %v2823_v37 }
  0x3d   :  { %v211_v23 = vand.u32 4294901760, %v210_v18  ;;  %v2847_v46 = vsub.f32 %v564_v31, %v2825_v38  ;;  %v2849_v47 = vand.u32 4294901760, %v562_v39  ;;  %v673_v48 = vand.u32 4294901760, %v672_v40  ;;  %v556_v31 = vld [vmem:[#allocation7 + $0x10] sm:$0xff]  ;;  %p2685_p10 = pnand %p2684_p9, %p2678_p6 }
  0x3e   :  { %v165_v25 = vand.u32 4294901760, %v164_v20  ;;  %2134 = vmatpush3.msra.mxu1 %v204_v22  ;;  %v686_v49 = vsub.f32 %v2813_v33, %v685_v41  ;;  %v699_v50 = vand.u32 4294901760, %v2835_v42  ;;  %v2860_v51 = vsub.f32 %v563_v35, %v2837_v43  ;;  %v557_v20 = vld [vmem:[#allocation7 + $0x18] sm:$0xff] }
  0x3f   :  { %2135 = vmatprep.subr.mxu1 %v2711_v0  ;;  %v680_v52 = vand.u32 4294901760, %v679_v44  ;;  %v693_v53 = vsub.f32 %v2823_v37, %v692_v45  ;;  %v706_v54 = vand.u32 4294901760, %v2847_v46  ;;  %v2872_v55 = vsub.f32 %v562_v39, %v2849_v47 }
  0x40   :  { %2131 = vmatmul.mubr.f32.vlgmr.msra.gmra.mxu0 %v165_v25  ;;  %2136 = vmatpush3.msra.mxu1 %v211_v23  ;;  %v687_v56 = vand.u32 4294901760, %v686_v49  ;;  %v700_v57 = vsub.f32 %v2835_v42, %v699_v50  ;;  %v713_v58 = vand.u32 4294901760, %v2860_v51  ;;  %v2943_v19 = vand.u32 4294901760, %v558_v14  ;;  %v555_v49 = vld [vmem:[#allocation7 + $0x8] sm:$0xff] }
  0x41   :  { %2141 = vmatpush3.msra.mxu0 %v201_v8  ;;  %2138 = vmatmul.mubr.f32.vlgmr.msra.gmra.mxu1 %v2785_v7  ;;  %v694_v59 = vand.u32 4294901760, %v693_v53  ;;  %v707_v60 = vsub.f32 %v2847_v46, %v706_v54  ;;  %v720_v61 = vand.u32 4294901760, %v2872_v55  ;;  %v2955_v28 = vand.u32 4294901760, %v557_v20 }
  0x42   :  { %2142 = vmatprep.subr.mxu0 %v2711_v0  ;;  %2147 = vmatprep.subr.mxu1 %v2711_v0  ;;  %v701_v62 = vand.u32 4294901760, %v700_v57  ;;  %v714_v63 = vsub.f32 %v2860_v51, %v713_v58  ;;  %v2952_v25 = vsub.f32 %v558_v14, %v2943_v19  ;;  %v2962_v44 = vand.u32 4294901760, %v556_v31 }
  0x43   :  { %2143 = vmatpush3.msra.mxu0 %v208_v9  ;;  %2144 = vmatprep.mubr.msk.f32.mxu0 %vm2712_vm0, %v2711_v0  ;;  %v708_v1 = vand.u32 4294901760, %v707_v60  ;;  %v721_v2 = vsub.f32 %v2872_v55, %v720_v61  ;;  %v2975_v57 = vand.u32 4294901760, %v555_v49  ;;  %v554_v60 = vld [vmem:[#allocation7] sm:$0xff] }
  0x44   :  { %2148 = vmatpush3.msra.mxu1 %v2781_v4  ;;  %2145 = vmatmul.mubr.f32.vlgmr.msra.gmra.mxu0 %v162_v11  ;;  %v715_v3 = vand.u32 4294901760, %v714_v63  ;;  %v3559_v40 = vand.u32 4294901760, %v2952_v25 }
  0x45   :  { %2149 = vmatprep.subr.mxu1 %v2711_v0  ;;  %2154 = vmatprep.subr.mxu0 %v2711_v0 }
  0x46   :  { %2150 = vmatpush3.msra.mxu1 %v2783_v5  ;;  %2151 = vmatprep.mubr.msk.f32.mxu1 %vm2712_vm0, %v2711_v0  ;;  %v749_v53 = vsub.f32 %v2952_v25, %v3559_v40 }
  0x47   :  { %2155 = vmatpush3.msra.mxu0 %v202_v12  ;;  %2152 = vmatmul.mubr.f32.vlgmr.msra.gmra.mxu1 %v163_v15 }
  0x48   :  { %2156 = vmatprep.subr.mxu0 %v2711_v0  ;;  %2161 = vmatprep.subr.mxu1 %v2711_v0 }
  0x49   :  { %2157 = vmatpush3.msra.mxu0 %v209_v13  ;;  %2158 = vmatprep.mubr.msk.f32.mxu0 %vm2712_vm0, %v2711_v0  ;;  %v2932_v13 = vand.u32 4294901760, %v559_v10 }
  0x4a   :  { %2162 = vmatpush3.msra.mxu1 %v2781_v4  ;;  %2159 = vmatmul.mubr.f32.vlgmr.msra.gmra.mxu0 %v2785_v7  ;;  %v722_v4 = vand.u32 4294901760, %v721_v2  ;;  %v2985_v2 = vand.u32 4294901760, %v554_v60 }
  0x4b   :  { %2163 = vmatprep.subr.mxu1 %v2711_v0  ;;  %2165 = vmatprep.mubr.msk.f32.mxu1 %vm2712_vm0, %v2711_v0  ;;  %v2941_v18 = vsub.f32 %v559_v10, %v2932_v13 }
  0x4c   :  { %2164 = vmatpush3.msra.mxu1 %v2783_v5  ;;  %2168 = vmatprep.subr.mxu0 %v2711_v0  ;;  %v561_v5 = vld [vmem:[#allocation7 + $0x38] sm:$0xff] }
  0x4d   :  { %2166 = vmatmul.mubr.f32.vlgmr.msra.gmra.mxu1 %v2785_v7  ;;  %2203 = vmatprep.subr.mxu1 %v2711_v0  ;;  %v2919_v6 = vand.u32 4294901760, %v561_v5  ;;  %v560_v7 = vld [vmem:[#allocation7 + $0x30] sm:$0xff]  ;;  %v3560_v24 = vand.u32 4294901760, %v2941_v18 }
  0x4e   :  { %2204 = vmatpush3.msra.mxu1 %v673_v48  ;;  %2169 = vmatpush3.msra.mxu0 %v2794_v16  ;;  %v2924_v9 = vand.u32 4294901760, %v560_v7  ;;  %v2966_v48 = vsub.f32 %v557_v20, %v2955_v28 }
  0x4f   :  { %2205 = vmatprep.subr.mxu1 %v2711_v0  ;;  %2170 = vmatprep.subr.mxu0 %v2711_v0  ;;  %v2922_v8 = vsub.f32 %v561_v5, %v2919_v6  ;;  %v742_v39 = vsub.f32 %v2941_v18, %v3560_v24 }
  0x50   :  { %2206 = vmatpush3.msra.mxu1 %v680_v52  ;;  %2171 = vmatpush3.msra.mxu0 %v2796_v21  ;;  %v2930_v12 = vsub.f32 %v560_v7, %v2924_v9  ;;  %v2998_v7 = vsub.f32 %v554_v60, %v2985_v2 }
  0x51   :  { %2207 = vmatprep.subr.mxu1 %v2711_v0  ;;  %2172 = vmatprep.subr.mxu0 %v2711_v0  ;;  %v727_v11 = vand.u32 4294901760, %v2922_v8  ;;  %v743_v52 = vand.u32 4294901760, %v742_v39 }
  0x52   :  { %2208 = vmatpush3.msra.mxu1 %v687_v56  ;;  %2173 = vmatpush3.msra.mxu0 %v2801_v27  ;;  %v734_v17 = vand.u32 4294901760, %v2930_v12  ;;  %v2973_v56 = vsub.f32 %v556_v31, %v2962_v44  ;;  %v3555_v20 = vand.u32 4294901760, %v2998_v7 }
  0x53   :  { %2209 = vmatprep.subr.mxu1 %v2711_v0  ;;  %2174 = vmatprep.subr.mxu0 %v2711_v0  ;;  %v728_v15 = vsub.f32 %v2922_v8, %v727_v11 }
  0x54   :  { %2210 = vmatpush3.msra.mxu1 %v694_v59  ;;  %2175 = vmatpush3.msra.mxu0 %v2807_v30  ;;  %v735_v23 = vsub.f32 %v2930_v12, %v734_v17  ;;  %v3558_v59 = vand.u32 4294901760, %v2966_v48  ;;  %v3557_v63 = vand.u32 4294901760, %v2973_v56 }
  0x55   :  { %2211 = vmatprep.subr.mxu1 %v2711_v0  ;;  %2176 = vmatprep.subr.mxu0 %v2711_v0  ;;  %v729_v22 = vand.u32 4294901760, %v728_v15 }
  0x56   :  { %2212 = vmatpush3.msra.mxu1 %v701_v62  ;;  %2177 = vmatpush3.msra.mxu0 %v2815_v34  ;;  %v736_v35 = vand.u32 4294901760, %v735_v23  ;;  %v750_v62 = vand.u32 4294901760, %v749_v53  ;;  %v777_v23 = vsub.f32 %v2998_v7, %v3555_v20 }
  0x57   :  { %2213 = vmatprep.subr.mxu1 %v2711_v0  ;;  %2178 = vmatprep.subr.mxu0 %v2711_v0 }
  0x58   :  { %2214 = vmatpush3.msra.mxu1 %v708_v1  ;;  %2179 = vmatpush3.msra.mxu0 %v2825_v38  ;;  %v2983_v1 = vsub.f32 %v555_v49, %v2975_v57  ;;  %v778_v31 = vand.u32 4294901760, %v777_v23 }
  0x59   :  { %2215 = vmatprep.subr.mxu1 %v2711_v0  ;;  %2180 = vmatprep.subr.mxu0 %v2711_v0 }
  0x5a   :  { %2216 = vmatpush3.msra.mxu1 %v715_v3  ;;  %2181 = vmatpush3.msra.mxu0 %v2837_v43  ;;  %v756_v3 = vsub.f32 %v2966_v48, %v3558_v59  ;;  %v3556_v5 = vand.u32 4294901760, %v2983_v1 }
  0x5b   :  { %2217 = vmatprep.subr.mxu1 %v2711_v0  ;;  %2182 = vmatprep.subr.mxu0 %v2711_v0 }
  0x5c   :  { %2218 = vmatpush3.msra.mxu1 %v722_v4  ;;  %2183 = vmatpush3.msra.mxu0 %v2849_v47  ;;  %v763_v4 = vsub.f32 %v2973_v56, %v3557_v63  ;;  %v757_v10 = vand.u32 4294901760, %v756_v3  ;;  %v770_v15 = vsub.f32 %v2983_v1, %v3556_v5 }
  0x5d   :  { %2219 = vmatprep.subr.mxu1 %v2711_v0  ;;  %2184 = vmatprep.subr.mxu0 %v2711_v0 }
  0x5e   :  { %2235 = vmatprep.mubr.msk.f32.mxu1 %vm2712_vm0, %v2711_v0  ;;  %2200 = vmatprep.mubr.msk.f32.mxu0 %vm2712_vm0, %v2711_v0  ;;  %v764_v14 = vand.u32 4294901760, %v763_v4 }
  0x5f   :  { %2185 = vmatpush3.msra.mxu0 %v2919_v6  ;;  %2220 = vmatpush3.msra.mxu1 %v729_v22  ;;  %v771_v22 = vand.u32 4294901760, %v770_v15 }
  0x60   :  { %2186 = vmatprep.subr.mxu0 %v2711_v0  ;;  %2221 = vmatprep.subr.mxu1 %v2711_v0 }
  0x61   :  { %2187 = vmatpush3.msra.mxu0 %v2924_v9  ;;  %2222 = vmatpush3.msra.mxu1 %v736_v35  ;;  %v1901_v35 = vld [vmem:[%s3549_s2] ss:$0 sm:$0xff] }
  0x62   :  { %2188 = vmatprep.subr.mxu0 %v2711_v0  ;;  %2223 = vmatprep.subr.mxu1 %v2711_v0 }
  0x63   :  { %2189 = vmatpush3.msra.mxu0 %v2932_v13  ;;  %2224 = vmatpush3.msra.mxu1 %v743_v52 }
  0x64   :  { %2190 = vmatprep.subr.mxu0 %v2711_v0  ;;  %2225 = vmatprep.subr.mxu1 %v2711_v0 }
  0x65   :  { %2191 = vmatpush3.msra.mxu0 %v2943_v19  ;;  %2226 = vmatpush3.msra.mxu1 %v750_v62 }
  0x66   :  { %2192 = vmatprep.subr.mxu0 %v2711_v0  ;;  %2227 = vmatprep.subr.mxu1 %v2711_v0 }
  0x67   :  { %2193 = vmatpush3.msra.mxu0 %v2955_v28  ;;  %2228 = vmatpush3.msra.mxu1 %v757_v10 }
  0x68   :  { %2194 = vmatprep.subr.mxu0 %v2711_v0  ;;  %2229 = vmatprep.subr.mxu1 %v2711_v0 }
  0x69   :  { %2195 = vmatpush3.msra.mxu0 %v2962_v44  ;;  %2230 = vmatpush3.msra.mxu1 %v764_v14 }
  0x6a   :  { %2196 = vmatprep.subr.mxu0 %v2711_v0  ;;  %2231 = vmatprep.subr.mxu1 %v2711_v0 }
  0x6b   :  { %2197 = vmatpush3.msra.mxu0 %v2975_v57  ;;  %2232 = vmatpush3.msra.mxu1 %v771_v22 }
  0x6c   :  { %2198 = vmatprep.subr.mxu0 %v2711_v0  ;;  %2233 = vmatprep.subr.mxu1 %v2711_v0 }
  0x6d   :  { %2199 = vmatpush3.msra.mxu0 %v2985_v2  ;;  %2234 = vmatpush3.msra.mxu1 %v778_v31 }
  0x6e   :  { %2238 = vmatprep.subr.mxu0 %v2711_v0  ;;  %2273 = vmatprep.subr.mxu1 %v2711_v0 }
 0x100   :  { %v167_v39 = vpop.f32.mrf.mxu0 }
 0x101   :  { %v168_v49 = vadd.f32 %v1901_v35, %v167_v39  ;;  %v248_v53 = vpop.f32.mrf.mxu1 }
 0x102   :  { %v2132_v52 = vpop.f32.mrf.mxu0 }
 0x103   :  { %v249_v60 = vadd.f32 %v248_v53, %v168_v49  ;;  %v2139_v62 = vpop.f32.mrf.mxu1 }
 0x104   :  { %v324_v3 = vpop.f32.mrf.mxu0  ;;  %v1226_v62 = vld [vmem:[#allocation8 + $0x38] sm:$0xff] }
 0x105   :  { %v325_v4 = vadd.f32 %v324_v3, %v249_v60 }
 0x106   :  { %v2146_v10 = vpop.f32.mrf.mxu0 }
 0x107   :  { %v399_v14 = vpop.f32.mrf.mxu1  ;;  %v3274_v10 = vand.u32 4294901760, %v1226_v62 }
 0x108   :  { %v400_v15 = vadd.f32 %v399_v14, %v325_v4  ;;  %v1225_v14 = vld [vmem:[#allocation8 + $0x30] sm:$0xff] }
 0x109   :  { %v2153_v22 = vpop.f32.mrf.mxu1 }
 0x10a   :  { %v476_v23 = vpop.f32.mrf.mxu0  ;;  %v3280_v22 = vsub.f32 %v1226_v62, %v3274_v10 }
 0x10b   :  { %v477_v31 = vadd.f32 %v476_v23, %v400_v15  ;;  %v3282_v23 = vand.u32 4294901760, %v1225_v14 }
 0x10c   :  { %v2160_v20 = vpop.f32.mrf.mxu0 }
 0x10d   :  { %v549_v5 = vpop.f32.mrf.mxu1 }
 0x10e   :  { %v550_v63 = vadd.f32 %v549_v5, %v477_v31  ;;  %v1224_v31 = vld [vmem:[#allocation8 + $0x28] sm:$0xff] }
 0x10f   :  { %v2167_v59 = vpop.f32.mrf.mxu1 }
 0x110   :  { %v553_v40 = vmax.f32 %v550_v63, 0.0 }
 0x112   :  { %v3018_v24 = vand.u32 4294901760, %v553_v40 }
 0x114   :  { %v3021_v35 = vsub.f32 %v553_v40, %v3018_v24  ;;  %2236 = vmatmul.mubr.f32.vlgmr.msra.gmra.mxu1 %v3018_v24 }
 0x115   :  { %2274 = vmatpush3.msra.mxu1 %v2794_v16  ;;  %2305 = vmatprep.mubr.msk.f32.mxu1 %vm2712_vm0, %v2711_v0 }
 0x116   :  { %v660_v39 = vand.u32 4294901760, %v3021_v35  ;;  %2275 = vmatprep.subr.mxu1 %v2711_v0 }
 0x117   :  { %2276 = vmatpush3.msra.mxu1 %v2796_v21 }
 0x118   :  { %v661_v59 = vsub.f32 %v3021_v35, %v660_v39  ;;  %2277 = vmatprep.subr.mxu1 %v2711_v0 }
 0x119   :  { %2278 = vmatpush3.msra.mxu1 %v2801_v27 }
 0x11a   :  { %2279 = vmatprep.subr.mxu1 %v2711_v0  ;;  %v662_v40 = vand.u32 4294901760, %v661_v59  ;;  %v3289_v59 = vsub.f32 %v1225_v14, %v3282_v23 }
 0x11b   :  { %2280 = vmatpush3.msra.mxu1 %v2807_v30 }
 0x11c   :  { %2281 = vmatprep.subr.mxu1 %v2711_v0  ;;  %2201 = vmatmul.mubr.f32.vlgmr.msra.gmra.mxu0 %v662_v40  ;;  %v3291_v40 = vand.u32 4294901760, %v1224_v31 }
 0x11d   :  { %2239 = vmatpush3.msra.mxu0 %v2799_v26  ;;  %2282 = vmatpush3.msra.mxu1 %v2815_v34  ;;  %v3567_v26 = vand.u32 4294901760, %v2966_v48 }
 0x11e   :  { %2240 = vmatprep.subr.mxu0 %v2711_v0  ;;  %2283 = vmatprep.subr.mxu1 %v2711_v0 }
 0x11f   :  { %2241 = vmatpush3.msra.mxu0 %v2805_v29  ;;  %2284 = vmatpush3.msra.mxu1 %v2825_v38  ;;  %v3569_v29 = vand.u32 4294901760, %v2983_v1 }
 0x120   :  { %2242 = vmatprep.subr.mxu0 %v2711_v0  ;;  %2285 = vmatprep.subr.mxu1 %v2711_v0 }
 0x121   :  { %2243 = vmatpush3.msra.mxu0 %v2813_v33  ;;  %2286 = vmatpush3.msra.mxu1 %v2837_v43 }
 0x122   :  { %2244 = vmatprep.subr.mxu0 %v2711_v0  ;;  %2287 = vmatprep.subr.mxu1 %v2711_v0 }
 0x123   :  { %2245 = vmatpush3.msra.mxu0 %v2823_v37  ;;  %2288 = vmatpush3.msra.mxu1 %v2849_v47 }
 0x124   :  { %2246 = vmatprep.subr.mxu0 %v2711_v0  ;;  %2289 = vmatprep.subr.mxu1 %v2711_v0 }
 0x125   :  { %2247 = vmatpush3.msra.mxu0 %v2835_v42  ;;  %2290 = vmatpush3.msra.mxu1 %v2919_v6  ;;  %v1230_v42 = vld [vmem:[#allocation8 + $0x58] sm:$0xff] }
 0x126   :  { %2248 = vmatprep.subr.mxu0 %v2711_v0  ;;  %2291 = vmatprep.subr.mxu1 %v2711_v0 }
 0x127   :  { %2249 = vmatpush3.msra.mxu0 %v2847_v46  ;;  %2292 = vmatpush3.msra.mxu1 %v2924_v9  ;;  %v3197_v46 = vand.u32 4294901760, %v1230_v42 }
 0x128   :  { %2250 = vmatprep.subr.mxu0 %v2711_v0  ;;  %2293 = vmatprep.subr.mxu1 %v2711_v0 }
 0x129   :  { %2251 = vmatpush3.msra.mxu0 %v2860_v51  ;;  %2294 = vmatpush3.msra.mxu1 %v2932_v13  ;;  %v1227_v51 = vld [vmem:[#allocation8 + $0x40] sm:$0xff] }
 0x12a   :  { %2252 = vmatprep.subr.mxu0 %v2711_v0  ;;  %2295 = vmatprep.subr.mxu1 %v2711_v0 }
 0x12b   :  { %2253 = vmatpush3.msra.mxu0 %v2872_v55  ;;  %2296 = vmatpush3.msra.mxu1 %v2943_v19 }
 0x12c   :  { %2254 = vmatprep.subr.mxu0 %v2711_v0  ;;  %2297 = vmatprep.subr.mxu1 %v2711_v0 }
 0x12d   :  { %2255 = vmatpush3.msra.mxu0 %v2922_v8  ;;  %2298 = vmatpush3.msra.mxu1 %v2955_v28 }
 0x12e   :  { %2256 = vmatprep.subr.mxu0 %v2711_v0  ;;  %2299 = vmatprep.subr.mxu1 %v2711_v0 }
 0x12f   :  { %2257 = vmatpush3.msra.mxu0 %v2930_v12  ;;  %2300 = vmatpush3.msra.mxu1 %v2962_v44 }
 0x130   :  { %2258 = vmatprep.subr.mxu0 %v2711_v0  ;;  %2301 = vmatprep.subr.mxu1 %v2711_v0 }
 0x131   :  { %2259 = vmatpush3.msra.mxu0 %v2941_v18  ;;  %2302 = vmatpush3.msra.mxu1 %v2975_v57 }
 0x132   :  { %2260 = vmatprep.subr.mxu0 %v2711_v0  ;;  %2303 = vmatprep.subr.mxu1 %v2711_v0 }
 0x133   :  { %2261 = vmatpush3.msra.mxu0 %v2952_v25  ;;  %2304 = vmatpush3.msra.mxu1 %v2985_v2 }
 0x134   :  { %2262 = vmatprep.subr.mxu0 %v2711_v0  ;;  %2306 = vmatmul.mubr.f32.vlgmr.msra.gmra.mxu1 %v660_v39  ;;  %v1392_v39 = vand.u32 4294901760, %v3280_v22 }
 0x135   :  { %2343 = vmatprep.subr.mxu1 %v2711_v0  ;;  %2263 = vmatpush3.msra.mxu0 %v2966_v48 }
 0x136   :  { %2344 = vmatpush3.msra.mxu1 %v2794_v16  ;;  %2264 = vmatprep.subr.mxu0 %v2711_v0  ;;  %v3565_v16 = vand.u32 4294901760, %v2941_v18 }
 0x137   :  { %2345 = vmatprep.subr.mxu1 %v2711_v0  ;;  %2265 = vmatpush3.msra.mxu0 %v2973_v56 }
 0x138   :  { %2346 = vmatpush3.msra.mxu1 %v2796_v21  ;;  %2266 = vmatprep.subr.mxu0 %v2711_v0  ;;  %v3566_v21 = vand.u32 4294901760, %v2952_v25 }
 0x139   :  { %2347 = vmatprep.subr.mxu1 %v2711_v0  ;;  %2267 = vmatpush3.msra.mxu0 %v2983_v1 }
 0x13a   :  { %2348 = vmatpush3.msra.mxu1 %v2801_v27  ;;  %2268 = vmatprep.subr.mxu0 %v2711_v0  ;;  %v3568_v27 = vand.u32 4294901760, %v2973_v56 }
 0x13b   :  { %2349 = vmatprep.subr.mxu1 %v2711_v0  ;;  %2269 = vmatpush3.msra.mxu0 %v2998_v7 }
 0x13c   :  { %2270 = vmatprep.mubr.msk.f32.mxu0 %vm2712_vm0, %v2711_v0  ;;  %2350 = vmatpush3.msra.mxu1 %v2807_v30  ;;  %v3570_v30 = vand.u32 4294901760, %v2998_v7 }
 0x13d   :  { %2271 = vmatmul.mubr.f32.vlgmr.msra.gmra.mxu0 %v3021_v35  ;;  %2308 = vmatprep.subr.mxu0 %v2711_v0 }
 0x13e   :  { %2351 = vmatprep.subr.mxu1 %v2711_v0  ;;  %2309 = vmatpush3.msra.mxu0 %v671_v32  ;;  %v1234_v32 = vld [vmem:[#allocation8 + $0x78] sm:$0xff] }
 0x13f   :  { %2352 = vmatpush3.msra.mxu1 %v2815_v34  ;;  %2310 = vmatprep.subr.mxu0 %v2711_v0  ;;  %v3185_v33 = vand.u32 4294901760, %v1234_v32  ;;  %v1233_v34 = vld [vmem:[#allocation8 + $0x70] sm:$0xff] }
 0x140   :  { %2353 = vmatprep.subr.mxu1 %v2711_v0  ;;  %2311 = vmatpush3.msra.mxu0 %v678_v36  ;;  %v3190_v37 = vand.u32 4294901760, %v1233_v34 }
 0x141   :  { %2354 = vmatpush3.msra.mxu1 %v2825_v38  ;;  %2312 = vmatprep.subr.mxu0 %v2711_v0  ;;  %v3188_v36 = vsub.f32 %v1234_v32, %v3185_v33  ;;  %v1232_v38 = vld [vmem:[#allocation8 + $0x68] sm:$0xff] }
 0x142   :  { %2355 = vmatprep.subr.mxu1 %v2711_v0  ;;  %2313 = vmatpush3.msra.mxu0 %v685_v41  ;;  %v1231_v41 = vld [vmem:[#allocation8 + $0x60] sm:$0xff]  ;;  %v3202_v55 = vsub.f32 %v1233_v34, %v3190_v37 }
 0x143   :  { %2356 = vmatpush3.msra.mxu1 %v2837_v43  ;;  %2314 = vmatprep.subr.mxu0 %v2711_v0  ;;  %v3193_v43 = vand.u32 4294901760, %v1232_v38 }
 0x144   :  { %2357 = vmatprep.subr.mxu1 %v2711_v0  ;;  %2315 = vmatpush3.msra.mxu0 %v692_v45  ;;  %v3195_v45 = vand.u32 4294901760, %v1231_v41 }
 0x145   :  { %2358 = vmatpush3.msra.mxu1 %v2849_v47  ;;  %2316 = vmatprep.subr.mxu0 %v2711_v0  ;;  %v1229_v47 = vld [vmem:[#allocation8 + $0x50] sm:$0xff] }
 0x146   :  { %2359 = vmatprep.subr.mxu1 %v2711_v0  ;;  %2317 = vmatpush3.msra.mxu0 %v699_v50  ;;  %v1228_v50 = vld [vmem:[#allocation8 + $0x48] sm:$0xff]  ;;  %v3213_v8 = vsub.f32 %v1231_v41, %v3195_v45 }
 0x147   :  { %2360 = vmatpush3.msra.mxu1 %v2919_v6  ;;  %2318 = vmatprep.subr.mxu0 %v2711_v0  ;;  %v3210_v6 = vsub.f32 %v1232_v38, %v3193_v43 }
 0x148   :  { %2361 = vmatprep.subr.mxu1 %v2711_v0  ;;  %2319 = vmatpush3.msra.mxu0 %v706_v54  ;;  %v1336_v54 = vand.u32 4294901760, %v3188_v36 }
 0x149   :  { %2362 = vmatpush3.msra.mxu1 %v2924_v9  ;;  %2320 = vmatprep.subr.mxu0 %v2711_v0  ;;  %v3216_v9 = vsub.f32 %v1230_v42, %v3197_v46 }
 0x14a   :  { %2363 = vmatprep.subr.mxu1 %v2711_v0  ;;  %2321 = vmatpush3.msra.mxu0 %v713_v58  ;;  %v3205_v58 = vand.u32 4294901760, %v1229_v47  ;;  %v1337_v12 = vsub.f32 %v3188_v36, %v1336_v54 }
 0x14b   :  { %2364 = vmatpush3.msra.mxu1 %v2932_v13  ;;  %2322 = vmatprep.subr.mxu0 %v2711_v0  ;;  %v1343_v13 = vand.u32 4294901760, %v3202_v55  ;;  %v1364_v25 = vand.u32 4294901760, %v3216_v9 }
 0x14c   :  { %2365 = vmatprep.subr.mxu1 %v2711_v0  ;;  %2323 = vmatpush3.msra.mxu0 %v720_v61  ;;  %v3207_v61 = vand.u32 4294901760, %v1228_v50 }
 0x14d   :  { %2366 = vmatpush3.msra.mxu1 %v2943_v19  ;;  %2324 = vmatprep.subr.mxu0 %v2711_v0  ;;  %v1350_v19 = vand.u32 4294901760, %v3210_v6 }
 0x14e   :  { %2367 = vmatprep.subr.mxu1 %v2711_v0  ;;  %2325 = vmatpush3.msra.mxu0 %v727_v11  ;;  %v3219_v11 = vand.u32 4294901760, %v1227_v51  ;;  %v3230_v18 = vsub.f32 %v1228_v50, %v3207_v61 }
 0x14f   :  { %2368 = vmatpush3.msra.mxu1 %v2955_v28  ;;  %2326 = vmatprep.subr.mxu0 %v2711_v0  ;;  %v1338_v28 = vand.u32 4294901760, %v1337_v12 }
 0x150   :  { %2369 = vmatprep.subr.mxu1 %v2711_v0  ;;  %2327 = vmatpush3.msra.mxu0 %v734_v17  ;;  %v3226_v17 = vsub.f32 %v1229_v47, %v3205_v58  ;;  %v3242_v56 = vsub.f32 %v1227_v51, %v3219_v11  ;;  %v1378_v5 = vand.u32 4294901760, %v3230_v18  ;;  %v1221_v47 = vld [vmem:[#allocation8 + $0x10] sm:$0xff] }
 0x151   :  { %2370 = vmatpush3.msra.mxu1 %v2962_v44  ;;  %2328 = vmatprep.subr.mxu0 %v2711_v0  ;;  %v1344_v44 = vsub.f32 %v3202_v55, %v1343_v13 }
 0x152   :  { %2371 = vmatprep.subr.mxu1 %v2711_v0  ;;  %2329 = vmatpush3.msra.mxu0 %v3565_v16  ;;  %v1371_v48 = vand.u32 4294901760, %v3226_v17  ;;  %v1385_v52 = vand.u32 4294901760, %v3242_v56  ;;  %v1379_v60 = vsub.f32 %v3230_v18, %v1378_v5  ;;  %v1223_v16 = vld [vmem:[#allocation8 + $0x20] sm:$0xff] }
 0x153   :  { %2372 = vmatpush3.msra.mxu1 %v2975_v57  ;;  %2330 = vmatprep.subr.mxu0 %v2711_v0  ;;  %v1351_v57 = vsub.f32 %v3210_v6, %v1350_v19  ;;  %v1345_v1 = vand.u32 4294901760, %v1344_v44 }
 0x154   :  { %2373 = vmatprep.subr.mxu1 %v2711_v0  ;;  %2331 = vmatpush3.msra.mxu0 %v3566_v21  ;;  %v1372_v49 = vsub.f32 %v3226_v17, %v1371_v48  ;;  %v1386_v4 = vsub.f32 %v3242_v56, %v1385_v52  ;;  %v1380_v15 = vand.u32 4294901760, %v1379_v60  ;;  %v1393_v21 = vsub.f32 %v3280_v22, %v1392_v39 }
 0x155   :  { %2374 = vmatpush3.msra.mxu1 %v2985_v2  ;;  %2375 = vmatprep.mubr.msk.f32.mxu1 %vm2712_vm0, %v2711_v0  ;;  %v1365_v2 = vsub.f32 %v3216_v9, %v1364_v25  ;;  %v1352_v7 = vand.u32 4294901760, %v1351_v57  ;;  %v1220_v57 = vld [vmem:[#allocation8 + $0x8] sm:$0xff] }
 0x156   :  { %2332 = vmatprep.subr.mxu0 %v2711_v0  ;;  %2376 = vmatmul.mubr.f32.vlgmr.msra.gmra.mxu1 %v3018_v24  ;;  %v1373_v3 = vand.u32 4294901760, %v1372_v49  ;;  %v1387_v35 = vand.u32 4294901760, %v1386_v4  ;;  %v1394_v32 = vand.u32 4294901760, %v1393_v21  ;;  %v1219_v49 = vld [vmem:[#allocation8] sm:$0xff] }
 0x157   :  { %2333 = vmatpush3.msra.mxu0 %v3567_v26  ;;  %2340 = vmatprep.mubr.msk.f32.mxu0 %vm2712_vm0, %v2711_v0  ;;  %v1366_v53 = vand.u32 4294901760, %v1365_v2  ;;  %v1399_v26 = vand.u32 4294901760, %v3289_v59 }
 0x158   :  { %2334 = vmatprep.subr.mxu0 %v2711_v0  ;;  %2413 = vmatprep.subr.mxu1 %v2711_v0 }
 0x159   :  { %2335 = vmatpush3.msra.mxu0 %v3568_v27  ;;  %2445 = vmatprep.mubr.msk.f32.mxu1 %vm2712_vm0, %v2711_v0  ;;  %v3301_v27 = vsub.f32 %v1224_v31, %v3291_v40  ;;  %v1400_v34 = vsub.f32 %v3289_v59, %v1399_v26 }
 0x15a   :  { %2336 = vmatprep.subr.mxu0 %v2711_v0  ;;  %2414 = vmatpush3.msra.mxu1 %v1338_v28  ;;  %v3324_v28 = vand.u32 4294901760, %v1221_v47 }
 0x15b   :  { %2337 = vmatpush3.msra.mxu0 %v3569_v29  ;;  %2415 = vmatprep.subr.mxu1 %v2711_v0  ;;  %v3303_v29 = vand.u32 4294901760, %v1223_v16  ;;  %v1406_v38 = vand.u32 4294901760, %v3301_v27  ;;  %v1401_v50 = vand.u32 4294901760, %v1400_v34 }
 0x15c   :  { %2338 = vmatprep.subr.mxu0 %v2711_v0  ;;  %2416 = vmatpush3.msra.mxu1 %v1345_v1  ;;  %v3335_v2 = vsub.f32 %v1221_v47, %v3324_v28 }
 0x15d   :  { %2339 = vmatpush3.msra.mxu0 %v3570_v30  ;;  %2417 = vmatprep.subr.mxu1 %v2711_v0  ;;  %v1222_v30 = vld [vmem:[#allocation8 + $0x18] sm:$0xff]  ;;  %v3313_v41 = vsub.f32 %v1223_v16, %v3303_v29  ;;  %v1407_v51 = vsub.f32 %v3301_v27, %v1406_v38 }
 0x15e   :  { %2341 = vmatmul.mubr.f32.vlgmr.msra.gmra.mxu0 %v3018_v24  ;;  %2378 = vmatprep.subr.mxu0 %v2711_v0  ;;  %v1357_v24 = vand.u32 4294901760, %v3213_v8  ;;  %v3317_v42 = vand.u32 4294901760, %v1222_v30  ;;  %v3563_v60 = vand.u32 4294901760, %v3335_v2 }
 0x15f   :  { %2410 = vmatprep.mubr.msk.f32.mxu0 %vm2712_vm0, %v2711_v0  ;;  %2379 = vmatpush3.msra.mxu0 %v3185_v33  ;;  %v1413_v12 = vand.u32 4294901760, %v3313_v41 }
 0x160   :  { %2380 = vmatprep.subr.mxu0 %v2711_v0  ;;  %v1358_v63 = vsub.f32 %v3213_v8, %v1357_v24  ;;  %2418 = vmatpush3.msra.mxu1 %v1352_v7  ;;  %v3328_v44 = vsub.f32 %v1222_v30, %v3317_v42  ;;  %v3337_v7 = vand.u32 4294901760, %v1220_v57  ;;  %v1428_v14 = vsub.f32 %v3335_v2, %v3563_v60 }
 0x161   :  { %2381 = vmatpush3.msra.mxu0 %v3190_v37  ;;  %2419 = vmatprep.subr.mxu1 %v2711_v0  ;;  %v1414_v1 = vsub.f32 %v3313_v41, %v1413_v12 }
 0x162   :  { %2382 = vmatprep.subr.mxu0 %v2711_v0  ;;  %v1359_v20 = vand.u32 4294901760, %v1358_v63  ;;  %v1408_v63 = vand.u32 4294901760, %v1407_v51  ;;  %v3345_v62 = vsub.f32 %v1220_v57, %v3337_v7  ;;  %v1429_v16 = vand.u32 4294901760, %v1428_v14  ;;  %v1902_v14 = vld [vmem:[%s3551_s4] ss:$0 sm:$0xff] }
 0x163   :  { %2383 = vmatpush3.msra.mxu0 %v3193_v43 }
 0x164   :  { %2384 = vmatprep.subr.mxu0 %v2711_v0  ;;  %2420 = vmatpush3.msra.mxu1 %v1359_v20  ;;  %v3564_v20 = vand.u32 4294901760, %v3328_v44 }
 0x165   :  { %2385 = vmatpush3.msra.mxu0 %v3195_v45  ;;  %2421 = vmatprep.subr.mxu1 %v2711_v0 }
 0x166   :  { %2386 = vmatprep.subr.mxu0 %v2711_v0  ;;  %2422 = vmatpush3.msra.mxu1 %v1366_v53  ;;  %v1415_v53 = vand.u32 4294901760, %v1414_v1  ;;  %v1421_v4 = vsub.f32 %v3328_v44, %v3564_v20 }
 0x167   :  { %2387 = vmatpush3.msra.mxu0 %v3197_v46  ;;  %2423 = vmatprep.subr.mxu1 %v2711_v0 }
 0x168   :  { %2388 = vmatprep.subr.mxu0 %v2711_v0  ;;  %2424 = vmatpush3.msra.mxu1 %v1373_v3  ;;  %v3347_v3 = vand.u32 4294901760, %v1219_v49 }
 0x169   :  { %2389 = vmatpush3.msra.mxu0 %v3205_v58  ;;  %2425 = vmatprep.subr.mxu1 %v2711_v0 }
 0x16a   :  { %2390 = vmatprep.subr.mxu0 %v2711_v0  ;;  %2426 = vmatpush3.msra.mxu1 %v1380_v15  ;;  %v3562_v15 = vand.u32 4294901760, %v3345_v62  ;;  %v3360_v31 = vsub.f32 %v1219_v49, %v3347_v3 }
 0x16b   :  { %2391 = vmatpush3.msra.mxu0 %v3207_v61  ;;  %2427 = vmatprep.subr.mxu1 %v2711_v0 }
 0x16c   :  { %2392 = vmatprep.subr.mxu0 %v2711_v0  ;;  %2428 = vmatpush3.msra.mxu1 %v1387_v35  ;;  %v1422_v35 = vand.u32 4294901760, %v1421_v4  ;;  %v1435_v21 = vsub.f32 %v3345_v62, %v3562_v15  ;;  %v3561_v30 = vand.u32 4294901760, %v3360_v31 }
 0x16d   :  { %2393 = vmatpush3.msra.mxu0 %v3219_v11  ;;  %2429 = vmatprep.subr.mxu1 %v2711_v0 }
 0x16e   :  { %2394 = vmatprep.subr.mxu0 %v2711_v0  ;;  %2430 = vmatpush3.msra.mxu1 %v1394_v32  ;;  %v1436_v32 = vand.u32 4294901760, %v1435_v21  ;;  %v1442_v34 = vsub.f32 %v3360_v31, %v3561_v30 }
 0x16f   :  { %2395 = vmatpush3.msra.mxu0 %v3274_v10  ;;  %2431 = vmatprep.subr.mxu1 %v2711_v0 }
 0x170   :  { %2396 = vmatprep.subr.mxu0 %v2711_v0  ;;  %2432 = vmatpush3.msra.mxu1 %v1401_v50  ;;  %v1443_v47 = vand.u32 4294901760, %v1442_v34 }
 0x171   :  { %2397 = vmatpush3.msra.mxu0 %v3282_v23  ;;  %2433 = vmatprep.subr.mxu1 %v2711_v0 }
 0x172   :  { %2398 = vmatprep.subr.mxu0 %v2711_v0  ;;  %2434 = vmatpush3.msra.mxu1 %v1408_v63 }
 0x173   :  { %2399 = vmatpush3.msra.mxu0 %v3291_v40  ;;  %2435 = vmatprep.subr.mxu1 %v2711_v0 }
 0x174   :  { %2400 = vmatprep.subr.mxu0 %v2711_v0  ;;  %2436 = vmatpush3.msra.mxu1 %v1415_v53 }
 0x175   :  { %2401 = vmatpush3.msra.mxu0 %v3303_v29  ;;  %2437 = vmatprep.subr.mxu1 %v2711_v0 }
 0x176   :  { %2402 = vmatprep.subr.mxu0 %v2711_v0  ;;  %2438 = vmatpush3.msra.mxu1 %v1422_v35 }
 0x177   :  { %2403 = vmatpush3.msra.mxu0 %v3317_v42  ;;  %2439 = vmatprep.subr.mxu1 %v2711_v0 }
 0x178   :  { %2404 = vmatprep.subr.mxu0 %v2711_v0  ;;  %2440 = vmatpush3.msra.mxu1 %v1429_v16 }
 0x179   :  { %2405 = vmatpush3.msra.mxu0 %v3324_v28  ;;  %2441 = vmatprep.subr.mxu1 %v2711_v0 }
 0x17a   :  { %2406 = vmatprep.subr.mxu0 %v2711_v0  ;;  %2442 = vmatpush3.msra.mxu1 %v1436_v32 }
 0x17b   :  { %2407 = vmatpush3.msra.mxu0 %v3337_v7  ;;  %2443 = vmatprep.subr.mxu1 %v2711_v0 }
 0x17c   :  { %2408 = vmatprep.subr.mxu0 %v2711_v0  ;;  %2444 = vmatpush3.msra.mxu1 %v1443_v47 }
 0x17d   :  { %2409 = vmatpush3.msra.mxu0 %v3347_v3  ;;  %2483 = vmatprep.subr.mxu1 %v2711_v0 }
 0x17e   :  { %2448 = vmatprep.subr.mxu0 %v2711_v0 }
 0x1d4   :  { %v815_v50 = vpop.f32.mrf.mxu1 }
 0x1d6   :  { %v2237_v51 = vpop.f32.mrf.mxu1 }
 0x1dc   :  { %v664_v57 = vpop.f32.mrf.mxu0 }
 0x1dd   :  { %v665_v35 = vadd.f32 %v1902_v14, %v664_v57 }
 0x1de   :  { %v2202_v63 = vpop.f32.mrf.mxu0 }
 0x1df   :  { %v816_v21 = vadd.f32 %v815_v50, %v665_v35 }
 0x1f4   :  { %v1008_v1 = vpop.f32.mrf.mxu1 }
 0x1f6   :  { %v2307_v49 = vpop.f32.mrf.mxu1 }
 0x1fd   :  { %v919_v53 = vpop.f32.mrf.mxu0 }
 0x1fe   :  { %v920_v34 = vadd.f32 %v919_v53, %v816_v21 }
 0x1ff   :  { %v2272_v4 = vpop.f32.mrf.mxu0 }
 0x200   :  { %v1009_v47 = vadd.f32 %v1008_v1, %v920_v34 }
 0x216   :  { %v1214_v16 = vpop.f32.mrf.mxu1 }
 0x218   :  { %v2377_v32 = vpop.f32.mrf.mxu1 }
 0x21e   :  { %v1127_v30 = vpop.f32.mrf.mxu0 }
 0x21f   :  { %v1128_v15 = vadd.f32 %v1127_v30, %v1009_v47 }
 0x220   :  { %v2342_v60 = vpop.f32.mrf.mxu0 }
 0x221   :  { %v1215_v51 = vadd.f32 %v1214_v16, %v1128_v15 }
 0x223   :  { %v1218_v20 = vmax.f32 %v1215_v51, 0.0 }
 0x225   :  { %v3380_v63 = vand.u32 4294901760, %v1218_v20 }
 0x227   :  { %v3383_v49 = vsub.f32 %v1218_v20, %v3380_v63  ;;  %2446 = vmatmul.mubr.f32.vlgmr.msra.gmra.mxu1 %v3380_v63 }
 0x228   :  { %2484 = vmatpush3.msra.mxu1 %v3185_v33  ;;  %2515 = vmatprep.mubr.msk.f32.mxu1 %vm2712_vm0, %v2711_v0 }
 0x229   :  { %v1325_v50 = vand.u32 4294901760, %v3383_v49  ;;  %2485 = vmatprep.subr.mxu1 %v2711_v0 }
 0x22a   :  { %2486 = vmatpush3.msra.mxu1 %v3190_v37 }
 0x22b   :  { %2487 = vmatprep.subr.mxu1 %v2711_v0  ;;  %v1326_v60 = vsub.f32 %v3383_v49, %v1325_v50 }
 0x22c   :  { %2488 = vmatpush3.msra.mxu1 %v3193_v43 }
 0x22d   :  { %2489 = vmatprep.subr.mxu1 %v2711_v0  ;;  %v1327_v20 = vand.u32 4294901760, %v1326_v60 }
 0x22e   :  { %2490 = vmatpush3.msra.mxu1 %v3195_v45 }
 0x22f   :  { %2491 = vmatprep.subr.mxu1 %v2711_v0  ;;  %2411 = vmatmul.mubr.f32.vlgmr.msra.gmra.mxu0 %v1327_v20 }
 0x230   :  { %2449 = vmatpush3.msra.mxu0 %v3188_v36  ;;  %2492 = vmatpush3.msra.mxu1 %v3197_v46  ;;  %v3572_v36 = vand.u32 4294901760, %v3335_v2 }
 0x231   :  { %2450 = vmatprep.subr.mxu0 %v2711_v0  ;;  %2493 = vmatprep.subr.mxu1 %v2711_v0 }
 0x232   :  { %2451 = vmatpush3.msra.mxu0 %v3202_v55  ;;  %2494 = vmatpush3.msra.mxu1 %v3205_v58 }
 0x233   :  { %2452 = vmatprep.subr.mxu0 %v2711_v0  ;;  %2495 = vmatprep.subr.mxu1 %v2711_v0 }
 0x234   :  { %2453 = vmatpush3.msra.mxu0 %v3210_v6  ;;  %2496 = vmatpush3.msra.mxu1 %v3207_v61 }
 0x235   :  { %2454 = vmatprep.subr.mxu0 %v2711_v0  ;;  %2497 = vmatprep.subr.mxu1 %v2711_v0 }
 0x236   :  { %2455 = vmatpush3.msra.mxu0 %v3213_v8  ;;  %2498 = vmatpush3.msra.mxu1 %v3219_v11 }
 0x237   :  { %2456 = vmatprep.subr.mxu0 %v2711_v0  ;;  %2499 = vmatprep.subr.mxu1 %v2711_v0 }
 0x238   :  { %2457 = vmatpush3.msra.mxu0 %v3216_v9  ;;  %2500 = vmatpush3.msra.mxu1 %v3274_v10  ;;  %v1903_v9 = vld [vmem:[%s3553_s6] ss:$0 sm:$0xff] }
 0x239   :  { %2458 = vmatprep.subr.mxu0 %v2711_v0  ;;  %2501 = vmatprep.subr.mxu1 %v2711_v0 }
 0x23a   :  { %2459 = vmatpush3.msra.mxu0 %v3226_v17  ;;  %2502 = vmatpush3.msra.mxu1 %v3282_v23 }
 0x23b   :  { %2460 = vmatprep.subr.mxu0 %v2711_v0  ;;  %2503 = vmatprep.subr.mxu1 %v2711_v0 }
 0x23c   :  { %2461 = vmatpush3.msra.mxu0 %v3230_v18  ;;  %2504 = vmatpush3.msra.mxu1 %v3291_v40 }
 0x23d   :  { %2462 = vmatprep.subr.mxu0 %v2711_v0  ;;  %2505 = vmatprep.subr.mxu1 %v2711_v0 }
 0x23e   :  { %2463 = vmatpush3.msra.mxu0 %v3242_v56  ;;  %2506 = vmatpush3.msra.mxu1 %v3303_v29 }
 0x23f   :  { %2464 = vmatprep.subr.mxu0 %v2711_v0  ;;  %2507 = vmatprep.subr.mxu1 %v2711_v0 }
 0x240   :  { %2465 = vmatpush3.msra.mxu0 %v3280_v22  ;;  %2508 = vmatpush3.msra.mxu1 %v3317_v42 }
 0x241   :  { %2466 = vmatprep.subr.mxu0 %v2711_v0  ;;  %2509 = vmatprep.subr.mxu1 %v2711_v0 }
 0x242   :  { %2467 = vmatpush3.msra.mxu0 %v3289_v59  ;;  %2510 = vmatpush3.msra.mxu1 %v3324_v28 }
 0x243   :  { %2468 = vmatprep.subr.mxu0 %v2711_v0  ;;  %2511 = vmatprep.subr.mxu1 %v2711_v0 }
 0x244   :  { %2469 = vmatpush3.msra.mxu0 %v3301_v27  ;;  %2512 = vmatpush3.msra.mxu1 %v3337_v7 }
 0x245   :  { %2470 = vmatprep.subr.mxu0 %v2711_v0  ;;  %2513 = vmatprep.subr.mxu1 %v2711_v0 }
 0x246   :  { %2471 = vmatpush3.msra.mxu0 %v3313_v41  ;;  %2514 = vmatpush3.msra.mxu1 %v3347_v3 }
 0x247   :  { %2472 = vmatprep.subr.mxu0 %v2711_v0  ;;  %2516 = vmatmul.mubr.f32.vlgmr.msra.gmra.mxu1 %v1325_v50 }
 0x248   :  { %2553 = vmatprep.subr.mxu1 %v2711_v0  ;;  %2473 = vmatpush3.msra.mxu0 %v3328_v44 }
 0x249   :  { %2554 = vmatpush3.msra.mxu1 %v3185_v33  ;;  %2474 = vmatprep.subr.mxu0 %v2711_v0  ;;  %v3571_v33 = vand.u32 4294901760, %v3328_v44 }
 0x24a   :  { %2555 = vmatprep.subr.mxu1 %v2711_v0  ;;  %2475 = vmatpush3.msra.mxu0 %v3335_v2 }
 0x24b   :  { %2556 = vmatpush3.msra.mxu1 %v3190_v37  ;;  %2476 = vmatprep.subr.mxu0 %v2711_v0  ;;  %v3573_v37 = vand.u32 4294901760, %v3345_v62 }
 0x24c   :  { %2557 = vmatprep.subr.mxu1 %v2711_v0  ;;  %2477 = vmatpush3.msra.mxu0 %v3345_v62 }
 0x24d   :  { %2558 = vmatpush3.msra.mxu1 %v3193_v43  ;;  %2478 = vmatprep.subr.mxu0 %v2711_v0  ;;  %v3574_v43 = vand.u32 4294901760, %v3360_v31 }
 0x24e   :  { %2559 = vmatprep.subr.mxu1 %v2711_v0  ;;  %2479 = vmatpush3.msra.mxu0 %v3360_v31 }
 0x24f   :  { %2480 = vmatprep.mubr.msk.f32.mxu0 %vm2712_vm0, %v2711_v0  ;;  %2560 = vmatpush3.msra.mxu1 %v3195_v45 }
 0x250   :  { %2481 = vmatmul.mubr.f32.vlgmr.msra.gmra.mxu0 %v3383_v49  ;;  %2518 = vmatprep.subr.mxu0 %v2711_v0 }
 0x251   :  { %2561 = vmatprep.subr.mxu1 %v2711_v0  ;;  %2519 = vmatpush3.msra.mxu0 %v1336_v54 }
 0x252   :  { %2562 = vmatpush3.msra.mxu1 %v3197_v46  ;;  %2520 = vmatprep.subr.mxu0 %v2711_v0 }
 0x253   :  { %2563 = vmatprep.subr.mxu1 %v2711_v0  ;;  %2521 = vmatpush3.msra.mxu0 %v1343_v13 }
 0x254   :  { %2564 = vmatpush3.msra.mxu1 %v3205_v58  ;;  %2522 = vmatprep.subr.mxu0 %v2711_v0 }
 0x255   :  { %2565 = vmatprep.subr.mxu1 %v2711_v0  ;;  %2523 = vmatpush3.msra.mxu0 %v1350_v19 }
 0x256   :  { %2566 = vmatpush3.msra.mxu1 %v3207_v61  ;;  %2524 = vmatprep.subr.mxu0 %v2711_v0 }
 0x257   :  { %2567 = vmatprep.subr.mxu1 %v2711_v0  ;;  %2525 = vmatpush3.msra.mxu0 %v1357_v24 }
 0x258   :  { %2568 = vmatpush3.msra.mxu1 %v3219_v11  ;;  %2526 = vmatprep.subr.mxu0 %v2711_v0 }
 0x259   :  { %2569 = vmatprep.subr.mxu1 %v2711_v0  ;;  %2527 = vmatpush3.msra.mxu0 %v1364_v25 }
 0x25a   :  { %2570 = vmatpush3.msra.mxu1 %v3274_v10  ;;  %2528 = vmatprep.subr.mxu0 %v2711_v0 }
 0x25b   :  { %2571 = vmatprep.subr.mxu1 %v2711_v0  ;;  %2529 = vmatpush3.msra.mxu0 %v1371_v48 }
 0x25c   :  { %2572 = vmatpush3.msra.mxu1 %v3282_v23  ;;  %2530 = vmatprep.subr.mxu0 %v2711_v0 }
 0x25d   :  { %2573 = vmatprep.subr.mxu1 %v2711_v0  ;;  %2531 = vmatpush3.msra.mxu0 %v1378_v5 }
 0x25e   :  { %2574 = vmatpush3.msra.mxu1 %v3291_v40  ;;  %2532 = vmatprep.subr.mxu0 %v2711_v0 }
 0x25f   :  { %2575 = vmatprep.subr.mxu1 %v2711_v0  ;;  %2533 = vmatpush3.msra.mxu0 %v1385_v52 }
 0x260   :  { %2576 = vmatpush3.msra.mxu1 %v3303_v29  ;;  %2534 = vmatprep.subr.mxu0 %v2711_v0 }
 0x261   :  { %2577 = vmatprep.subr.mxu1 %v2711_v0  ;;  %2535 = vmatpush3.msra.mxu0 %v1392_v39 }
 0x262   :  { %2578 = vmatpush3.msra.mxu1 %v3317_v42  ;;  %2536 = vmatprep.subr.mxu0 %v2711_v0 }
 0x263   :  { %2579 = vmatprep.subr.mxu1 %v2711_v0  ;;  %2537 = vmatpush3.msra.mxu0 %v1399_v26 }
 0x264   :  { %2580 = vmatpush3.msra.mxu1 %v3324_v28  ;;  %2538 = vmatprep.subr.mxu0 %v2711_v0 }
 0x265   :  { %2581 = vmatprep.subr.mxu1 %v2711_v0  ;;  %2539 = vmatpush3.msra.mxu0 %v1406_v38 }
 0x266   :  { %2582 = vmatpush3.msra.mxu1 %v3337_v7  ;;  %2540 = vmatprep.subr.mxu0 %v2711_v0 }
 0x267   :  { %2583 = vmatprep.subr.mxu1 %v2711_v0  ;;  %2541 = vmatpush3.msra.mxu0 %v1413_v12 }
 0x268   :  { %2584 = vmatpush3.msra.mxu1 %v3347_v3  ;;  %2585 = vmatprep.mubr.msk.f32.mxu1 %vm2712_vm0, %v2711_v0 }
 0x269   :  { %2542 = vmatprep.subr.mxu0 %v2711_v0  ;;  %2586 = vmatmul.mubr.f32.vlgmr.msra.gmra.mxu1 %v3380_v63 }
 0x26a   :  { %2543 = vmatpush3.msra.mxu0 %v3571_v33  ;;  %2550 = vmatprep.mubr.msk.f32.mxu0 %vm2712_vm0, %v2711_v0 }
 0x26b   :  { %2544 = vmatprep.subr.mxu0 %v2711_v0 }
 0x26c   :  { %2545 = vmatpush3.msra.mxu0 %v3572_v36 }
 0x26d   :  { %2546 = vmatprep.subr.mxu0 %v2711_v0 }
 0x26e   :  { %2547 = vmatpush3.msra.mxu0 %v3573_v37 }
 0x26f   :  { %2548 = vmatprep.subr.mxu0 %v2711_v0 }
 0x270   :  { %2549 = vmatpush3.msra.mxu0 %v3574_v43 }
 0x271   :  { %2551 = vmatmul.mubr.f32.vlgmr.msra.gmra.mxu0 %v3380_v63 }
 0x2e7   :  { %v1480_v45 = vpop.f32.mrf.mxu1 }
 0x2e9   :  { %v2447_v46 = vpop.f32.mrf.mxu1 }
 0x2ef   :  { %v1329_v54 = vpop.f32.mrf.mxu0 }
 0x2f0   :  { %v1330_v11 = vadd.f32 %v1903_v9, %v1329_v54 }
 0x2f1   :  { %v2412_v55 = vpop.f32.mrf.mxu0 }
 0x2f2   :  { %v1481_v0 = vadd.f32 %v1480_v45, %v1330_v11 }
 0x307   :  { %v1673_v58 = vpop.f32.mrf.mxu1 }
 0x309   :  { %v2517_v61 = vpop.f32.mrf.mxu1 }
 0x310   :  { %v1584_v6 = vpop.f32.mrf.mxu0 }
 0x311   :  { %v1585_v18 = vadd.f32 %v1584_v6, %v1481_v0 }
 0x312   :  { %v2482_v8 = vpop.f32.mrf.mxu0 }
 0x313   :  { %v1674_v19 = vadd.f32 %v1673_v58, %v1585_v18 }
 0x329   :  { %v1879_v13 = vpop.f32.mrf.mxu1 }
 0x32b   :  { %v2587_v17 = vpop.f32.mrf.mxu1 }
 0x331   :  { %v1792_v24 = vpop.f32.mrf.mxu0 }
 0x332   :  { %v1793_v25 = vadd.f32 %v1792_v24, %v1674_v19 }
 0x333   :  { %v2552_v48 = vpop.f32.mrf.mxu0 }
 0x334   :  { %v1880_v56 = vadd.f32 %v1879_v13, %v1793_v25 }
 0x336   :  { %1883 = vst [vmem:[#allocation10] sm:$0xff] %v1880_v56 }
 0x337   :  { %2688 = shalt.err (!%p2685_p10)
}
 0x338   :  { %1893 = dma.vmem_to_hbm [thread:$0]  %s1891_s24, 128, %s3554_s7, [#allocation4]  }
 0x339   :  { %2703 = dma.done.wait [#allocation4], 128  }
 0x33a   :  { %2704 = vsyncadd [#allocation4], 4294967168 }
 0x33b   :  { %1897 = vsyncpa [#allocation3], 1 }
 0x33c   :  { %1898 = vsyncpa [#allocation6], 1 }
 0x33d   :  { %1899 = vsyncpa [#allocation9], 1 }
 0x33e   :  { %1900 = vsyncpa [#allocation4], 1 }

</bundles_post_ra>
